<compile_context>
chip_gen: v5e
topology: v5e:2x2
jax: 0.10.0
libtpu: 0.0.40
codegen_flags: <defaults>
</compile_context>

<pallas_src>
import functools

import jax
import jax.numpy as jnp
from jax.experimental import pallas as pl
from jax.experimental.pallas import tpu as pltpu

# ------------------- config (mirrors cfg.CASCADE_RCNN) -------------------
NUM_STAGE = 3
TEST_STAGE = 3
TEST_ENSEMBLE = True
STAGE_WEIGHTS = (1.0, 0.5, 0.25)      # only used by the (untranslated) train path
NUM_CLASSES = 5
POOL = 4                              # ROI pooled resolution P x P
HIDDEN = 32                           # MLP head hidden dim (stands in for 1024)
BBOX_REG_WEIGHTS = ((10.0, 10.0, 5.0, 5.0),
                    (20.0, 20.0, 10.0, 10.0),
                    (30.0, 30.0, 15.0, 15.0))

LANE = 128
HP = LANE                             # padded hidden width (32 -> 128)
NOUT = NUM_CLASSES + 4 * NUM_CLASSES  # 25 real output columns (cls | bbox)
NP = LANE                             # padded output width  (25 -> 128)
TK_CAP = 512                          # max fc6 K-tile (bounds v7x VMEM use)


def _round_up(x, m):
    return ((x + m - 1) // m) * m


def _pick_tk(kp, cap=TK_CAP):
    """Largest multiple of LANE <= cap that divides kp (kp % LANE == 0)."""
    for tk in range(min(cap, kp), 0, -LANE):
        if kp % tk == 0:
            return tk
    return kp


def _resident_spec(shape):
    """Constant-index block: single VMEM buffer (double-buffering a block whose
    index never changes only wastes VMEM).  Falls back to default pipelining if
    the installed JAX doesn't accept pipeline_mode."""
    try:
        return pl.BlockSpec(shape, lambda i, k: (0, 0),
                            pipeline_mode=pl.Buffered(1))
    except (TypeError, AttributeError):
        return pl.BlockSpec(shape, lambda i, k: (0, 0))


# ------------------------- fused Pallas stage kernel ----------------------
def _stage_head_kernel(pooled_ref, w6_ref, b6_ref, w7_ref, b7_ref,
                       wo_ref, bo_ref, *outs_and_scratch, emit_x):
    """K-tiled fc6 accumulate -> (on last K tile) ReLU -> fc7+ReLU -> [cls|bbox].

    Intermediates never leave VMEM/vregs; padded columns stay exactly zero
    (zero weights + zero bias) so slicing outside recovers the real result.
    """
    if emit_x:
        x_ref, y_ref, acc_ref = outs_and_scratch
    else:
        y_ref, acc_ref = outs_and_scratch
    k = pl.program_id(1)

    @pl.when(k == 0)
    def _():
        acc_ref[...] = jnp.zeros_like(acc_ref)

    # bf16 x bf16 -> f32 on the MXU; partial fc6 product accumulates in VMEM.
    acc_ref[...] += jnp.dot(pooled_ref[...], w6_ref[...],
                            preferred_element_type=jnp.float32)

    @pl.when(k == pl.num_programs(1) - 1)
    def _():
        h = jnp.maximum(acc_ref[...] + b6_ref[...], 0.0).astype(jnp.bfloat16)
        x = jnp.maximum(
            jnp.dot(h, w7_ref[...], preferred_element_type=jnp.float32)
            + b7_ref[...], 0.0)
        y = jnp.dot(x.astype(jnp.bfloat16), wo_ref[...],
                    preferred_element_type=jnp.float32) + bo_ref[...]
        if emit_x:
            x_ref[...] = x.astype(x_ref.dtype)
        y_ref[...] = y.astype(y_ref.dtype)


def pallas_stage_head(pooled_pad, p, *, tm, emit_x):
    """One cascade stage's Box_Head + Output as a single pallas_call.

    pooled_pad: [MP, KP] bf16 with MP % tm == 0 and KP % LANE == 0.
    Returns y_pad [MP, NP] (and x_pad [MP, HP] when emit_x); caller slices.
    """
    MP, KP = pooled_pad.shape
    tk = _pick_tk(KP)
    grid = (MP // tm, KP // tk)

    in_specs = [
        pl.BlockSpec((tm, tk), lambda i, k: (i, k)),   # pooled rows x K tile
        pl.BlockSpec((tk, HP), lambda i, k: (k, 0)),   # fc6 weight K tile
        _resident_spec((1, HP)),                       # fc6 bias
        _resident_spec((HP, HP)),                      # fc7 weight (resident)
        _resident_spec((1, HP)),                       # fc7 bias
        _resident_spec((HP, NP)),                      # cls|bbox weight (resident)
        _resident_spec((1, NP)),                       # cls|bbox bias
    ]
    y_spec = pl.BlockSpec((tm, NP), lambda i, k: (i, 0))
    if emit_x:
        out_shape = (jax.ShapeDtypeStruct((MP, HP), jnp.float32),
                     jax.ShapeDtypeStruct((MP, NP), jnp.float32))
        out_specs = (pl.BlockSpec((tm, HP), lambda i, k: (i, 0)), y_spec)
    else:
        out_shape = jax.ShapeDtypeStruct((MP, NP), jnp.float32)
        out_specs = y_spec

    # Explicit VMEM budget from tile math (+ headroom); the default scoped limit
    # is too small for the production-size head, and free to set at toy sizes.
    vmem_est = (2 * tm * tk * 2                  # pooled tile, double-buffered bf16
                + 2 * tk * HP * 2                # fc6 weight tile, dbl-buffered bf16
                + (HP * HP + HP * NP) * 2        # resident fc7 / out weights bf16
                + (2 * HP + NP) * 4              # biases (f32)
                + 2 * tm * (HP + NP) * 4         # outputs, double-buffered f32
                + tm * HP * 4)                   # f32 accumulator scratch
    vmem_limit = int(max(32 << 20, min(2 * vmem_est + (8 << 20), 100 << 20)))

    kernel = functools.partial(_stage_head_kernel, emit_x=emit_x)
    return pl.pallas_call(
        kernel,
        out_shape=out_shape,
        grid=grid,
        in_specs=in_specs,
        out_specs=out_specs,
        scratch_shapes=[pltpu.VMEM((tm, HP), jnp.float32)],
        compiler_params=pltpu.CompilerParams(
            dimension_semantics=("parallel", "arbitrary"),
            vmem_limit_bytes=vmem_limit),
    )(pooled_pad, p["fc6_w"], p["fc6_b"], p["fc7_w"], p["fc7_b"],
      p["out_w"], p["out_b"])


# ------------------------- plain-JAX glue --------------------------------
def roi_pool(features, rois, batch_idx, spatial_scale, pool=POOL):
    """Nearest-neighbor crop/resize ROI pooling over NCHW features (bf16 out).
    TODO(synk): exact ROIAlign bilinear sampling not reproduced."""
    N, C, H, W = features.shape

    def one(roi, b):
        x1, y1, x2, y2 = roi * spatial_scale
        xs = x1 + (jnp.arange(pool, dtype=jnp.float32) + 0.5) * (x2 - x1) / pool
        ys = y1 + (jnp.arange(pool, dtype=jnp.float32) + 0.5) * (y2 - y1) / pool
        xi = jnp.clip(jnp.floor(xs), 0, W - 1).astype(jnp.int32)
        yi = jnp.clip(jnp.floor(ys), 0, H - 1).astype(jnp.int32)
        fmap = features[b]                                  # [C, H, W]
        crop = fmap[:, yi[:, None], xi[None, :]]            # [C, P, P]
        return crop.reshape(-1).astype(jnp.bfloat16)        # row-major C*P*P

    return jax.vmap(one)(rois, batch_idx)


def pooled_features_padded(features, proposals, batch_idx, spatial_scale, MP, KP):
    """ROI pool and emit a lane-aligned [MP, KP] bf16 buffer in one write
    (no separate jnp.pad HBM round-trip; bf16 cast fused into the gather)."""
    pooled = roi_pool(features, proposals, batch_idx, spatial_scale)  # [R, K] bf16
    R, K = pooled.shape
    if (R, K) == (MP, KP):
        return pooled
    return jnp.zeros((MP, KP), jnp.bfloat16).at[:R, :K].set(pooled)


def decode_boxes(boxes, deltas, weights, img_size):
    wx, wy, ww, wh = weights
    widths = boxes[:, 2] - boxes[:, 0] + 1.0
    heights = boxes[:, 3] - boxes[:, 1] + 1.0
    ctr_x = boxes[:, 0] + 0.5 * widths
    ctr_y = boxes[:, 1] + 0.5 * heights
    dx = deltas[:, 0] / wx
    dy = deltas[:, 1] / wy
    dw = jnp.minimum(deltas[:, 2] / ww, 4.135)   # log(1000/16) clamp
    dh = jnp.minimum(deltas[:, 3] / wh, 4.135)
    pred_ctr_x = dx * widths + ctr_x
    pred_ctr_y = dy * heights + ctr_y
    pred_w = jnp.exp(dw) * widths
    pred_h = jnp.exp(dh) * heights
    x1 = pred_ctr_x - 0.5 * pred_w
    y1 = pred_ctr_y - 0.5 * pred_h
    x2 = pred_ctr_x + 0.5 * pred_w - 1.0
    y2 = pred_ctr_y + 0.5 * pred_h - 1.0
    out = jnp.stack([x1, y1, x2, y2], axis=-1)
    return jnp.clip(out, 0.0, img_size - 1.0)


def refine_proposals(boxes, box_regression, class_logits, weights, img_size):
    R = boxes.shape[0]
    labels = jnp.argmax(class_logits, axis=-1)
    deltas = box_regression.reshape(R, NUM_CLASSES, 4)[jnp.arange(R), labels]
    return decode_boxes(boxes, deltas, weights, img_size)


# ------------------------- parameters ------------------------------------
def init_params(key, dim_in):
    """Weights are stored already zero-padded to lane-dense shapes and in bf16
    (native MXU dtype, half the HBM->VMEM DMA bytes); biases stay f32 since they
    add onto the f32 accumulator."""
    K = dim_in * POOL * POOL
    KP = _round_up(K, LANE)
    params = []
    for _ in range(NUM_STAGE):
        key, k0, k1, k2, k3 = jax.random.split(key, 5)
        fc6 = 0.02 * jax.random.normal(k0, (K, HIDDEN), jnp.float32)
        fc7 = 0.02 * jax.random.normal(k1, (HIDDEN, HIDDEN), jnp.float32)
        cls_w = 0.01 * jax.random.normal(k2, (HIDDEN, NUM_CLASSES), jnp.float32)
        bbox_w = 0.001 * jax.random.normal(k3, (HIDDEN, 4 * NUM_CLASSES), jnp.float32)
        params.append(dict(
            fc6_w=jnp.zeros((KP, HP), jnp.bfloat16)
                    .at[:K, :HIDDEN].set(fc6.astype(jnp.bfloat16)),
            fc6_b=jnp.zeros((1, HP), jnp.float32),
            fc7_w=jnp.zeros((HP, HP), jnp.bfloat16)
                    .at[:HIDDEN, :HIDDEN].set(fc7.astype(jnp.bfloat16)),
            fc7_b=jnp.zeros((1, HP), jnp.float32),
            out_w=(jnp.zeros((HP, NP), jnp.bfloat16)
                   .at[:HIDDEN, :NUM_CLASSES].set(cls_w.astype(jnp.bfloat16))
                   .at[:HIDDEN, NUM_CLASSES:NOUT].set(bbox_w.astype(jnp.bfloat16))),
            out_b=jnp.zeros((1, NP), jnp.float32),
        ))
    return params


# ------------------------- CascadeRCNN forward (test) --------------------
def cascade_rcnn_forward_test(params, features, rois, batch_idx,
                              spatial_scale, img_size):
    R = rois.shape[0]
    K = features.shape[1] * POOL * POOL
    KP = params[0]["fc6_w"].shape[0]
    # Row tile: keep >= 2 row tiles whenever R > 8 so both v7x TensorCores are
    # used; cap at 128.  TODO(synk): raise cap to 256 on v6e/v7x at production R.
    r8 = _round_up(R, 8)
    tm = 8 if r8 <= 8 else min(128, _round_up(r8 // 2, 8))
    MP = _round_up(r8, tm)

    ms_scores = []
    proposals = rois
    x = None
    for i in range(NUM_STAGE):
        p = params[i]
        emit_x = (i == TEST_STAGE - 1)   # earlier stages' x is never consumed
        # Box_Head_{i+1} + Output_{i+1}: one fused Pallas kernel.
        pooled_pad = pooled_features_padded(features, proposals, batch_idx,
                                            spatial_scale, MP, KP)
        if emit_x:
            x_pad, y_pad = pallas_stage_head(pooled_pad, p, tm=tm, emit_x=True)
            x = x_pad[:R, :HIDDEN]
        else:
            y_pad = pallas_stage_head(pooled_pad, p, tm=tm, emit_x=False)
        class_logits = y_pad[:R, :NUM_CLASSES]
        box_regression = y_pad[:R, NUM_CLASSES:NOUT]
        ms_scores.append(class_logits)

        if i < TEST_STAGE - 1:
            # box_post_processor (is_train=False): decode + feed as next proposals
            proposals = refine_proposals(proposals, box_regression, class_logits,
                                         BBOX_REG_WEIGHTS[i], img_size)
        else:
            if TEST_ENSEMBLE:
                assert len(ms_scores) == TEST_STAGE
                avg_logits = sum(ms_scores) / float(TEST_STAGE)
            else:
                avg_logits = class_logits
            # tiny [R, NUM_CLASSES] softmax: cheaper in plain jnp than a launch
            class_probs = jax.nn.softmax(avg_logits, axis=-1)
            final_boxes = refine_proposals(proposals, box_regression, class_logits,
                                           BBOX_REG_WEIGHTS[i], img_size)
            # TODO(synk): per-class score filtering + NMS of box_post_processor
            result = (final_boxes, class_probs)
            return x, result, {}
    return x, (proposals, None), {}


# ------------------------------- main -------------------------------------
if __name__ == "__main__":
    key = jax.random.PRNGKey(0)
    k_feat, k_ctr, k_wh, k_param = jax.random.split(key, 4)

    # features: NCHW, batch=2, channels=dim_in=4, spatial 16x16
    dim_in = 4
    features = jax.random.normal(k_feat, (2, dim_in, 16, 16), jnp.float32)
    spatial_scale = 0.25
    img_size = 64.0

    # 8 proposals per image -> 16 ROIs total, boxes in image coords [x1,y1,x2,y2]
    n_per_img = 8
    ctr = jax.random.uniform(k_ctr, (2 * n_per_img, 2), minval=8.0, maxval=56.0)
    wh = jax.random.uniform(k_wh, (2 * n_per_img, 2), minval=8.0, maxval=24.0)
    rois = jnp.clip(jnp.concatenate([ctr - wh / 2, ctr + wh / 2], axis=-1),
                    0.0, img_size - 1.0)
    batch_idx = jnp.repeat(jnp.arange(2, dtype=jnp.int32), n_per_img)

    params = init_params(k_param, dim_in)

    x, (boxes, probs), losses = cascade_rcnn_forward_test(
        params, features, rois, batch_idx, spatial_scale, img_size)

    jax.block_until_ready((x, boxes, probs))
    assert x.shape == (2 * n_per_img, HIDDEN)
    assert boxes.shape == (2 * n_per_img, 4)
    assert probs.shape == (2 * n_per_img, NUM_CLASSES)
    assert bool(jnp.all(jnp.isfinite(x)))
    assert bool(jnp.all(jnp.isfinite(boxes)))
    assert bool(jnp.allclose(jnp.sum(probs, axis=-1), 1.0, atol=1e-5))
    print("KERNEL_OK")
</pallas_src>

<mosaic_0001>
module attributes {stable_mosaic.version = 11 : i64} {
  func.func @_stage_head_kernel(%arg0: i32, %arg1: i32, %arg2: memref<8x128xbf16, #tpu.memory_space<vmem>>, %arg3: memref<128x128xbf16, #tpu.memory_space<vmem>>, %arg4: memref<1x128xf32, #tpu.memory_space<vmem>>, %arg5: memref<128x128xbf16, #tpu.memory_space<vmem>>, %arg6: memref<1x128xf32, #tpu.memory_space<vmem>>, %arg7: memref<128x128xbf16, #tpu.memory_space<vmem>>, %arg8: memref<1x128xf32, #tpu.memory_space<vmem>>, %arg9: memref<8x128xf32, #tpu.memory_space<vmem>>, %arg10: memref<8x128xf32, #tpu.memory_space<vmem>>) attributes {dimension_semantics = [#tpu.dimension_semantics<parallel>, #tpu.dimension_semantics<arbitrary>], iteration_bounds = array<i64: 2, 1>, scalar_prefetch = 0 : i64, scratch_operands = 1 : i64, tpu.core_type = #tpu.core_type<tc>, window_params = [{transform_indices = @transform_0, window_bounds = array<i64: 8, 128>}, {transform_indices = @transform_1, window_bounds = array<i64: 128, 128>}, {pipeline_mode = #tpu.pipeline_mode<synchronous>, transform_indices = @transform_2, window_bounds = array<i64: 1, 128>}, {pipeline_mode = #tpu.pipeline_mode<synchronous>, transform_indices = @transform_3, window_bounds = array<i64: 128, 128>}, {pipeline_mode = #tpu.pipeline_mode<synchronous>, transform_indices = @transform_4, window_bounds = array<i64: 1, 128>}, {pipeline_mode = #tpu.pipeline_mode<synchronous>, transform_indices = @transform_5, window_bounds = array<i64: 128, 128>}, {pipeline_mode = #tpu.pipeline_mode<synchronous>, transform_indices = @transform_6, window_bounds = array<i64: 1, 128>}, {transform_indices = @transform_7, window_bounds = array<i64: 8, 128>}]} {
    %c0_i32 = arith.constant 0 : i32
    %0 = arith.cmpi eq, %arg1, %c0_i32 : i32
    %1 = arith.extui %0 : i1 to i32
    %c0_i32_0 = arith.constant 0 : i32
    %2 = arith.cmpi ne, %1, %c0_i32_0 : i32
    scf.if %2 {
      %cst_10 = arith.constant 0.000000e+00 : f32
      %12 = vector.broadcast %cst_10 : f32 to vector<8x128xf32>
      %c0_11 = arith.constant 0 : index
      %c0_12 = arith.constant 0 : index
      %13 = vector.load %arg10[%c0_11, %c0_12] : memref<8x128xf32, #tpu.memory_space<vmem>>, vector<8x128xf32>
      tpu.vector_store %arg10[%c0_11, %c0_12], %12 {strides = array<i32>} : memref<8x128xf32, #tpu.memory_space<vmem>>, vector<8x128xf32>,
    } else {
    }
    %c0 = arith.constant 0 : index
    %c0_1 = arith.constant 0 : index
    %3 = vector.load %arg10[%c0, %c0_1] : memref<8x128xf32, #tpu.memory_space<vmem>>, vector<8x128xf32>
    %c0_2 = arith.constant 0 : index
    %c0_3 = arith.constant 0 : index
    %4 = vector.load %arg2[%c0_2, %c0_3] : memref<8x128xbf16, #tpu.memory_space<vmem>>, vector<8x128xbf16>
    %c0_4 = arith.constant 0 : index
    %c0_5 = arith.constant 0 : index
    %5 = vector.load %arg3[%c0_4, %c0_5] : memref<128x128xbf16, #tpu.memory_space<vmem>>, vector<128x128xbf16>
    %cst = arith.constant dense<0.000000e+00> : vector<8x128xf32>
    %6 = tpu.matmul %4, %5, %cst {dimension_numbers = #tpu.dot_dimension_numbers<[1], [0], [0], [1], [0, 0, 1, 1], [], []>} : vector<8x128xbf16>, vector<128x128xbf16>, vector<8x128xf32> -> vector<8x128xf32>
    %7 = arith.addf %3, %6 : vector<8x128xf32>
    %c0_6 = arith.constant 0 : index
    %c0_7 = arith.constant 0 : index
    %8 = vector.load %arg10[%c0_6, %c0_7] : memref<8x128xf32, #tpu.memory_space<vmem>>, vector<8x128xf32>
    tpu.vector_store %arg10[%c0_6, %c0_7], %7 {strides = array<i32>} : memref<8x128xf32, #tpu.memory_space<vmem>>, vector<8x128xf32>,
    %c0_i32_8 = arith.constant 0 : i32
    %9 = arith.cmpi eq, %arg1, %c0_i32_8 : i32
    %10 = arith.extui %9 : i1 to i32
    %c0_i32_9 = arith.constant 0 : i32
    %11 = arith.cmpi ne, %10, %c0_i32_9 : i32
    scf.if %11 {
      %c0_10 = arith.constant 0 : index
      %c0_11 = arith.constant 0 : index
      %12 = vector.load %arg10[%c0_10, %c0_11] : memref<8x128xf32, #tpu.memory_space<vmem>>, vector<8x128xf32>
      %c0_12 = arith.constant 0 : index
      %c0_13 = arith.constant 0 : index
      %13 = vector.load %arg4[%c0_12, %c0_13] : memref<1x128xf32, #tpu.memory_space<vmem>>, vector<1x128xf32>
      %14 = vector.broadcast %13 : vector<1x128xf32> to vector<8x128xf32>
      %15 = arith.addf %12, %14 : vector<8x128xf32>
      %cst_14 = arith.constant 0.000000e+00 : f32
      %16 = vector.broadcast %cst_14 : f32 to vector<8x128xf32>
      %17 = arith.maximumf %15, %16 : vector<8x128xf32>
      %18 = arith.truncf %17 : vector<8x128xf32> to vector<8x128xbf16>
      %c0_15 = arith.constant 0 : index
      %c0_16 = arith.constant 0 : index
      %19 = vector.load %arg5[%c0_15, %c0_16] : memref<128x128xbf16, #tpu.memory_space<vmem>>, vector<128x128xbf16>
      %cst_17 = arith.constant dense<0.000000e+00> : vector<8x128xf32>
      %20 = tpu.matmul %18, %19, %cst_17 {dimension_numbers = #tpu.dot_dimension_numbers<[1], [0], [0], [1], [0, 0, 1, 1], [], []>} : vector<8x128xbf16>, vector<128x128xbf16>, vector<8x128xf32> -> vector<8x128xf32>
      %c0_18 = arith.constant 0 : index
      %c0_19 = arith.constant 0 : index
      %21 = vector.load %arg6[%c0_18, %c0_19] : memref<1x128xf32, #tpu.memory_space<vmem>>, vector<1x128xf32>
      %22 = vector.broadcast %21 : vector<1x128xf32> to vector<8x128xf32>
      %23 = arith.addf %20, %22 : vector<8x128xf32>
      %cst_20 = arith.constant 0.000000e+00 : f32
      %24 = vector.broadcast %cst_20 : f32 to vector<8x128xf32>
      %25 = arith.maximumf %23, %24 : vector<8x128xf32>
      %26 = arith.truncf %25 : vector<8x128xf32> to vector<8x128xbf16>
      %c0_21 = arith.constant 0 : index
      %c0_22 = arith.constant 0 : index
      %27 = vector.load %arg7[%c0_21, %c0_22] : memref<128x128xbf16, #tpu.memory_space<vmem>>, vector<128x128xbf16>
      %cst_23 = arith.constant dense<0.000000e+00> : vector<8x128xf32>
      %28 = tpu.matmul %26, %27, %cst_23 {dimension_numbers = #tpu.dot_dimension_numbers<[1], [0], [0], [1], [0, 0, 1, 1], [], []>} : vector<8x128xbf16>, vector<128x128xbf16>, vector<8x128xf32> -> vector<8x128xf32>
      %c0_24 = arith.constant 0 : index
      %c0_25 = arith.constant 0 : index
      %29 = vector.load %arg8[%c0_24, %c0_25] : memref<1x128xf32, #tpu.memory_space<vmem>>, vector<1x128xf32>
      %30 = vector.broadcast %29 : vector<1x128xf32> to vector<8x128xf32>
      %31 = arith.addf %28, %30 : vector<8x128xf32>
      %c0_26 = arith.constant 0 : index
      %c0_27 = arith.constant 0 : index
      %32 = vector.load %arg9[%c0_26, %c0_27] : memref<8x128xf32, #tpu.memory_space<vmem>>, vector<8x128xf32>
      tpu.vector_store %arg9[%c0_26, %c0_27], %31 {strides = array<i32>} : memref<8x128xf32, #tpu.memory_space<vmem>>, vector<8x128xf32>,
    } else {
    }
    return
  }
  func.func @transform_0(%arg0: i32, %arg1: i32) -> (i32, i32) {
    %c0_i32 = arith.constant 0 : i32
    return %arg0, %arg1 : i32, i32
  }
  func.func @transform_1(%arg0: i32, %arg1: i32) -> (i32, i32) {
    %c0_i32 = arith.constant 0 : i32
    %c0_i32_0 = arith.constant 0 : i32
    return %arg1, %c0_i32 : i32, i32
  }
  func.func @transform_2(%arg0: i32, %arg1: i32) -> (i32, i32) {
    %c0_i32 = arith.constant 0 : i32
    %c0_i32_0 = arith.constant 0 : i32
    %c0_i32_1 = arith.constant 0 : i32
    return %c0_i32, %c0_i32_0 : i32, i32
  }
  func.func @transform_3(%arg0: i32, %arg1: i32) -> (i32, i32) {
    %c0_i32 = arith.constant 0 : i32
    %c0_i32_0 = arith.constant 0 : i32
    %c0_i32_1 = arith.constant 0 : i32
    return %c0_i32, %c0_i32_0 : i32, i32
  }
  func.func @transform_4(%arg0: i32, %arg1: i32) -> (i32, i32) {
    %c0_i32 = arith.constant 0 : i32
    %c0_i32_0 = arith.constant 0 : i32
    %c0_i32_1 = arith.constant 0 : i32
    return %c0_i32, %c0_i32_0 : i32, i32
  }
  func.func @transform_5(%arg0: i32, %arg1: i32) -> (i32, i32) {
    %c0_i32 = arith.constant 0 : i32
    %c0_i32_0 = arith.constant 0 : i32
    %c0_i32_1 = arith.constant 0 : i32
    return %c0_i32, %c0_i32_0 : i32, i32
  }
  func.func @transform_6(%arg0: i32, %arg1: i32) -> (i32, i32) {
    %c0_i32 = arith.constant 0 : i32
    %c0_i32_0 = arith.constant 0 : i32
    %c0_i32_1 = arith.constant 0 : i32
    return %c0_i32, %c0_i32_0 : i32, i32
  }
  func.func @transform_7(%arg0: i32, %arg1: i32) -> (i32, i32) {
    %c0_i32 = arith.constant 0 : i32
    %c0_i32_0 = arith.constant 0 : i32
    return %arg0, %c0_i32 : i32, i32
  }
}

</mosaic_0001>

<bundles_post_ra>
// kernel: tpu_custom_call.1
= control target key start
LH: loop header
LB: loop body
LE: loop exit
PB: predicated region body
PF: predicated region fallthrough
CT: control target
= control target key end

     0   :  { %s1432_s0 = inlined_call_operand.hbm [shape: bf16[16,128], index: 0, kind: input, shape index: {}]   ;;  %s1433_s1 = inlined_call_operand.hbm [shape: bf16[128,128], index: 1, kind: input, shape index: {}]   ;;  %s1434_s2 = inlined_call_operand.vmem [shape: f32[1,128], index: 2, kind: input, shape index: {}]   ;;  %s1435_s3 = inlined_call_operand.hbm [shape: bf16[128,128], index: 3, kind: input, shape index: {}]   ;;  %s1436_s4 = inlined_call_operand.vmem [shape: f32[1,128], index: 4, kind: input, shape index: {}]   ;;  %s1437_s5 = inlined_call_operand.hbm [shape: bf16[128,128], index: 5, kind: input, shape index: {}]   ;;  %s1438_s6 = inlined_call_operand.vmem [shape: f32[1,128], index: 6, kind: input, shape index: {}]   ;;  %s1439_s7 = inlined_call_operand.hbm [shape: f32[16,128], index: 7, kind: output, shape index: {}]  }
   0x1   :  { %1440 = sst [smem:[#allocation16_spill]] %s1433_s1 }
   0x2   :  { %1441 = sst [smem:[#allocation17_spill]] %s1435_s3 }
   0x3   :  { %12 = vsyncpa [#allocation4], 0 }
   0x4   :  { %14 = vsyncpa [#allocation4 + $0x1], 0 }
   0x5   :  { %15 = vsyncpa [#allocation7], 0 }
   0x6   :  { %16 = vsyncpa [#allocation10], 0 }
   0x7   :  { %17 = vsyncpa [#allocation5], 0 }
   0x8   :  { %19 = vsyncpa [#allocation5 + $0x1], 0  ;;  %s1252_s24 = smov 0   ;;  %s1254_s25 = smov 0  }
   0x9   :  { %s1256_s26 = smov 0   ;;  %s1258_s27 = smov 0  }
   0xa   :  { %s1260_s28 = smov 0   ;;  %s1262_s29 = smov 0  }
   0xb LB: > { %s758_s30 = sadd.s32 4294967295, %s1205_s29   ;;  %p760_p0 = scmp.ge.s32.totalorder %s1205_s29, 1  ;;  %s1205_s29 = sphi %s1262_s29, %s25_s29   ;;  %s1201_s28 = sphi %s1260_s28, %s1455_s28   ;;  %s1197_s27 = sphi %s1258_s27, %s1454_s27   ;;  %s1193_s26 = sphi %s1256_s26, %s1453_s26   ;;  %s1189_s25 = sphi %s1254_s25, %s1452_s25   ;;  %s1185_s24 = sphi %s1252_s24, %s1451_s24  }
   0xc   : > { %p1286_p1 = scmp.eq.s32.totalorder %s758_s30, 0  ;;  %p227_p2 = scmp.lt.s32.totalorder %s1205_s29, 3 }
   0xd   : > { %s1443_s1 = sld [smem:[#allocation16_spill]]  ;;  %s1207_s13 = smov [#allocation6]  }
   0xe   : > { %p1294_p3 = pnand %p760_p0, %p227_p2  ;;  %s243_s14 = sshll.u32 %s1207_s13, 4  ;;  %s244_s14 = int_to_ptr.vmem [resolvable:$true] %s243_s14 }
   0xf   : > { %p764_p6 = scmp.ge.s32.totalorder %s1205_s29, 2  ;;  %s1446_s3 = sld [smem:[#allocation17_spill]] }
  0x10   : > { %p913_p4 = pneg %p1294_p3  ;;  %s1208_s19 = smov 64  }
  0x11   : > { %s1209_s20 = smov 4   ;;  %s1210_s21 = smov [#allocation8]  }
  0x12   : > { %p1302_p5 = pnand %p913_p4, %p1286_p1  ;;  %s260_s22 = sshll.u32 %s1210_s21, 4  ;;  %s261_s22 = int_to_ptr.vmem [resolvable:$true] %s260_s22 }
  0x13   : > { %s241_s11 = sshll.u32 %s1443_s1, 4  ;;  %s275_s10 = sshll.u32 %s1437_s5, 4  ;;  %s242_s11 = int_to_ptr.hbm [resolvable:$true] %s241_s11  ;;  %s276_s10 = int_to_ptr.hbm [resolvable:$true] %s275_s10 }
  0x14   : > { %916 = dma.hbm_to_vmem [thread:$0]  (!%p1302_p5), %s242_s11, 1024, %s244_s14, [#allocation7], %s1208_s19, %s1208_s19, %s1209_s20  }
  0x15   : > { %s258_s18 = sshll.u32 %s1446_s3, 4  ;;  %s1211_s13 = smov [#allocation9]   ;;  %s259_s18 = int_to_ptr.hbm [resolvable:$true] %s258_s18 }
  0x16   : > { %919 = dma.hbm_to_vmem [thread:$0]  (!%p1302_p5), %s259_s18, 1024, %s261_s22, [#allocation7], %s1208_s19, %s1208_s19, %s1209_s20  }
  0x17   : > { %s277_s16 = sshll.u32 %s1211_s13, 4  ;;  %s759_s11 = sadd.s32 4294967294, %s1205_s29   ;;  %s278_s16 = int_to_ptr.vmem [resolvable:$true] %s277_s16 }
  0x18   : > { %922 = dma.hbm_to_vmem [thread:$0]  (!%p1302_p5), %s276_s10, 1024, %s278_s16, [#allocation10], %s1208_s19, %s1208_s19, %s1209_s20  }
  0x19   : > { %s37_s14 = sadd.s32 1, %s1201_s28  ;;  %s46_s17 = sadd.s32 1, %s1193_s26 }
  0x1a   : > { %p39_p7 = scmp.ge.s32.totalorder %s37_s14, 2  ;;  %p53_p8 = scmp.ne.s32.totalorder %s1193_s26, %s1189_s25 }
  0x1b   : > { %p54_p9 = scmp.eq.s32.totalorder %s1205_s29, 0  ;;  %p59_p10 = scmp.ne.s32.totalorder %s1189_s25, %s1185_s24 }
  0x1c   : > { %s1457_s14 = smov (%p39_p7, %s37_s14), 0  ;;  %p214_p13 = scmp.eq.s32.totalorder %s758_s30, 1 }
  0x1d   : > { %p1329_p11 = por %p54_p9, %p53_p8  ;;  %p1335_p12 = por %p1286_p1, %p59_p10 }
  0x1e   : > { %s41_s19 = ssub.s32 %s1201_s28, %s1457_s14  ;;  %p220_p2 = scmp.eq.s32.totalorder %s759_s11, 1 }
  0x1f   : > { %p44_p0 = scmp.eq.s32.totalorder %s41_s19, 0  ;;  %p1343_p4 = por %p214_p13, %p53_p8 }
  0x20   : > { %p934_p5 = scmp.lt.s32.totalorder %s1205_s29, 2  ;;  %p1351_p7 = por %p220_p2, %p59_p10 }
  0x21   : > { %s1349_s21 = scalar_select %p44_p0, %s1193_s26, %s46_s17  }
  0x22   : > { %s294_s23 = sand.u32 1, %s1193_s26   ;;  %s766_s10 = sshll.u32 %s1201_s28, 2 }
  0x23   : > { %s765_s9 = sshll.u32 %s294_s23, 2  ;;  %s303_s30 = scalar_lea.hbm %s1432_s0, %s766_s10 }
  0x24   : > { %s298_s19 = scalar_lea.vmem [#allocation3], %s765_s9  ;;  %s305_s1 = sshll.u32 %s303_s30, 4  ;;  %s306_s1 = int_to_ptr.hbm [resolvable:$true] %s305_s1 }
  0x25   : > { %s307_s11 = sshll.u32 %s298_s19, 4  ;;  %p924_p8 = pnand %p934_p5, %p1329_p11  ;;  %s308_s11 = int_to_ptr.vmem [resolvable:$true] %s307_s11 }
  0x26   : > { %s295_s17 = scalar_lea.sflag [#allocation4], %s294_s23  ;;  %316 = sbr.rel (%p1294_p3) target bundleno = 484 (0x1e4), region = 48 }
  0x27   : > { %926 = dma.hbm_to_vmem [thread:$0]  (!%p924_p8), %s306_s1, 64, %s308_s11, %s295_s17  }
  0x28   : > { %s1365_s3 = sand.u32 (!%p1294_p3), 1, %s1189_s25  }
  0x29   : > { %s768_s13 = sshll.u32 (!%p1294_p3), %s1365_s3, 2  ;;  %s319_s10 = scalar_lea.sflag (!%p1294_p3), [#allocation4], %s1365_s3 }
  0x2a   : > { %s1369_s9 = scalar_lea.vmem (!%p1294_p3), [#allocation3], %s768_s13 }
  0x2b   : > { %1168 = dma.done.wait (%p1335_p12), %s319_s10, 64  }
  0x2c   : > { %1170 = vsyncadd (%p1335_p12), %s319_s10, 4294967232 }
  0x2d   : > { %1172 = dma.done.wait (%p1286_p1), [#allocation7], 2048  }
  0x2e   : > { %1174 = vsyncadd (%p1286_p1), [#allocation7], 4294965248 }
  0x2f   : > { %1176 = dma.done.wait (%p1286_p1), [#allocation10], 1024  }
  0x30   : > { %1178 = vsyncadd (%p1286_p1), [#allocation10], 4294966272  ;;  %v880_v0 = vld [vmem:[#allocation6 + $0x38] sm:$0xff]  ;;  %v879_v1 = vld [vmem:[#allocation6 + $0x30] sm:$0xff]  ;;  %s870_s15 = sshll.u32 %s1197_s27, 3  ;;  %s772_s23 = sshll.u32 %s1365_s3, 3 }
  0x31   : > { %441 = vmatpush.bf16.msra.mxu0 %v880_v0  ;;  %v888_v2 = vld [vmem:[#allocation8 + $0x38] sm:$0xff]  ;;  %v887_v3 = vld [vmem:[#allocation8 + $0x30] sm:$0xff]  ;;  %v878_v4 = vld [vmem:[#allocation6 + $0x28] sm:$0xff]  ;;  %s643_s19 = scalar_lea.hbm %s1439_s7, %s870_s15  ;;  %s368_s13 = scalar_lea.vmem [#allocation11], %s772_s23 }
  0x32   : > { %535 = vmatpush.bf16.msra.mxu1 %v888_v2  ;;  %v886_v5 = vld [vmem:[#allocation8 + $0x28] sm:$0xff]  ;;  %v877_v6 = vld [vmem:[#allocation6 + $0x20] sm:$0xff]  ;;  %v876_v8 = vld [vmem:[#allocation6 + $0x18] sm:$0xff]  ;;  %s645_s10 = sshll.u32 %s368_s13, 4  ;;  %s633_s1 = scalar_lea.sflag [#allocation5], %s1365_s3  ;;  %s646_s10 = int_to_ptr.vmem [resolvable:$true] %s645_s10 }
  0x33   : > { %v885_v7 = vld [vmem:[#allocation8 + $0x20] sm:$0xff]  ;;  %v884_v9 = vld [vmem:[#allocation8 + $0x18] sm:$0xff]  ;;  %v875_v10 = vld [vmem:[#allocation6 + $0x10] sm:$0xff]  ;;  %s1135_s15 = scalar_lea.hbm %s1439_s7, 16 }
  0x34   : > { %v883_v11 = vld [vmem:[#allocation8 + $0x10] sm:$0xff]  ;;  %v874_v12 = vld [vmem:[#allocation6 + $0x8] sm:$0xff]  ;;  %v873_v13 = vld [vmem:[#allocation6] sm:$0xff] }
  0x35   : > { %442 = vmatpush.bf16.msra.mxu0 %v879_v1  ;;  %v376_v14 = vld [vmem:[%s1369_s9] sm:$0xf]  ;;  %v882_v15 = vld [vmem:[#allocation8 + $0x8] sm:$0xff]  ;;  %v881_v16 = vld [vmem:[#allocation8] sm:$0xff]  ;;  %s647_s9 = sshll.u32 %s643_s19, 4  ;;  %s648_s9 = int_to_ptr.hbm [resolvable:$true] %s647_s9 }
  0x36   : > { %536 = vmatpush.bf16.msra.mxu1 %v887_v3  ;;  %v896_v17 = vld [vmem:[#allocation9 + $0x38] sm:$0xff]  ;;  %v895_v18 = vld [vmem:[#allocation9 + $0x30] sm:$0xff]  ;;  %v894_v19 = vld [vmem:[#allocation9 + $0x28] sm:$0xff]  ;;  %s1129_s27 = sshra.s32 %s648_s9, 4  ;;  %s1130_s27 = int_to_ptr.hbm [resolvable:$true] %s1129_s27 }
  0x37   : > { %618 = vmatpush.bf16.msra.mxu2 %v896_v17  ;;  %v893_v20 = vld [vmem:[#allocation9 + $0x20] sm:$0xff]  ;;  %v892_v21 = vld [vmem:[#allocation9 + $0x18] sm:$0xff]  ;;  %v891_v22 = vld [vmem:[#allocation9 + $0x10] sm:$0xff]  ;;  %s1131_s8 = scalar_lea.hbm %s1130_s27, 8  ;;  %p1136_p10 = scmp.lt.s32.totalorder %s1130_s27, %s1439_s7 }
  0x38   : > { %v992_v23 = vld [vmem:[%s1434_s2] ss:$0 sm:$0xff]  ;;  %v890_v29 = vld [vmem:[#allocation9 + $0x8] sm:$0xff]  ;;  %v889_v30 = vld [vmem:[#allocation9] sm:$0xff]  ;;  %p1132_p1 = scmp.ne.s32.totalorder %s1130_s27, %s1131_s8  ;;  %p1137_p11 = scmp.lt.s32.totalorder %s1135_s15, %s1131_s8 }
  0x39   : > { %443 = vmatpush.bf16.msra.mxu0 %v878_v4  ;;  %v993_v31 = vld [vmem:[%s1436_s4] ss:$0 sm:$0xff] }
  0x3a   : > { %537 = vmatpush.bf16.msra.mxu1 %v886_v5  ;;  %v994_v37 = vld [vmem:[%s1438_s6] ss:$0 sm:$0xff]  ;;  %p1133_p3 = pnand %p1132_p1, %p1343_p4  ;;  %p1138_p12 = por %p1137_p11, %p1136_p10 }
  0x3b   : > { %619 = vmatpush.bf16.msra.mxu2 %v895_v18 }
  0x3c   : > { %p1134_p9 = pneg %p1133_p3 }
  0x3d   : > { %444 = vmatpush.bf16.msra.mxu0 %v877_v6 }
  0x3e   : > { %538 = vmatpush.bf16.msra.mxu1 %v885_v7  ;;  %p1139_p13 = pnand %p1138_p12, %p1134_p9 }
  0x3f   : > { %620 = vmatpush.bf16.msra.mxu2 %v894_v19 }
  0x41   : > { %445 = vmatpush.bf16.msra.mxu0 %v876_v8 }
  0x42   : > { %539 = vmatpush.bf16.msra.mxu1 %v884_v9 }
  0x43   : > { %621 = vmatpush.bf16.msra.mxu2 %v893_v20 }
  0x45   : > { %446 = vmatpush.bf16.msra.mxu0 %v875_v10 }
  0x46   : > { %540 = vmatpush.bf16.msra.mxu1 %v883_v11 }
  0x47   : > { %622 = vmatpush.bf16.msra.mxu2 %v892_v21 }
  0x49   : > { %447 = vmatpush.bf16.msra.mxu0 %v874_v12 }
  0x4a   : > { %541 = vmatpush.bf16.msra.mxu1 %v882_v15 }
  0x4b   : > { %623 = vmatpush.bf16.msra.mxu2 %v891_v22 }
  0x4d   : > { %448 = vmatpush.bf16.msra.mxu0 %v873_v13 }
  0x4e   : > { %542 = vmatpush.bf16.msra.mxu1 %v881_v16 }
  0x4f   : > { %624 = vmatpush.bf16.msra.mxu2 %v890_v29 }
  0x50   : > { %449 = vmatmul.bf16.vlgmr.msra.gmra.mxu0 %v376_v14 }
  0x53   : > { %625 = vmatpush.bf16.msra.mxu2 %v889_v30 }
  0xcd   : > { %v450_v24 = vpop.f32.mrf.mxu0 }
  0xce   : > { %v464_v25 = vadd.f32 %v992_v23, %v450_v24 }
  0xd0   : > { %v465_v26 = vmax.f32 %v464_v25, 0.0 }
  0xd2   : > { %v466_v27 = vpack.c.bf16 %v465_v26, %v465_v26 }
  0xd4   : > { %543 = vmatmul.bf16.vlgmr.msra.gmra.mxu1 %v466_v27 }
  0xd5   : > { %v452_v28 = vpop.f32.mrf.mxu0 }
 0x151   : > { %v544_v32 = vpop.f32.mrf.mxu1 }
 0x152   : > { %v545_v33 = vadd.f32 %v993_v31, %v544_v32 }
 0x154   : > { %v548_v34 = vmax.f32 %v545_v33, 0.0 }
 0x156   : > { %v549_v35 = vpack.c.bf16 %v548_v34, %v548_v34 }
 0x158   : > { %626 = vmatmul.bf16.vlgmr.msra.gmra.mxu2 %v549_v35 }
 0x159   : > { %v546_v36 = vpop.f32.mrf.mxu1 }
 0x1db   : > { %v627_v38 = vpop.f32.mrf.mxu2 }
 0x1dc   : > { %v628_v39 = vadd.f32 %v994_v37, %v627_v38 }
 0x1de   : > { %631 = vst [vmem:[%s368_s13] sm:$0xff] %v628_v39 }
 0x1df   : > { %1142 = shalt.err (!%p1139_p13)
}
 0x1e0   : > { %911 = dma.vmem_to_hbm [thread:$0]  (%p1343_p4), %s646_s10, 128, %s648_s9, %s633_s1  }
 0x1e3   : > { %v629_v40 = vpop.f32.mrf.mxu2 }
 0x1e4 PF: > { %s659_s3 = sand.u32 1, %s1185_s24   ;;  %p928_p0 = pnand %p764_p6, %p1351_p7 }
 0x1e5   : > { %s660_s30 = scalar_lea.sflag [#allocation5], %s659_s3 }
 0x1e6   : > { %p929_p2 = pneg %p928_p0 }
 0x1e8   : > { %1180 = dma.done.wait (%p929_p2), %s660_s30, 128  }
 0x1e9   : > { %1182 = vsyncadd (%p929_p2), %s660_s30, 4294967168  ;;  %s25_s29 = sadd.s32 1, %s1205_s29   ;;  %s1451_s24 = smov %s1189_s25 }
 0x1ea   : > { %p22_p5 = scmp.ge.s32.totalorder %s25_s29, 4   ;;  %s1452_s25 = smov %s1193_s26 }
 0x1eb   : > { %s1453_s26 = smov %s1349_s21  ;;  %s1454_s27 = smov %s1201_s28 }
 0x1ec   : > { %s1455_s28 = smov %s1457_s14  ;;  %24 = sbr.rel (!%p22_p5) target bundleno = 11 (0xb), region = 114 }
 0x1f1   :  { %666 = vsyncpa [#allocation4], 1 }
 0x1f2   :  { %668 = vsyncpa [#allocation4 + $0x1], 1 }
 0x1f3   :  { %669 = vsyncpa [#allocation7], 1 }
 0x1f4   :  { %670 = vsyncpa [#allocation10], 1 }
 0x1f5   :  { %671 = vsyncpa [#allocation5], 1 }
 0x1f6   :  { %673 = vsyncpa [#allocation5 + $0x1], 1 }

</bundles_post_ra>
